<compile_context>
chip_gen: v7x
topology: tpu7x:2x2x1
jax: 0.10.0
libtpu: 0.0.40
codegen_flags: <defaults>
</compile_context>

<pallas_src>
import jax
import jax.numpy as jnp
from jax.experimental import pallas as pl
from jax.experimental.pallas import tpu as pltpu


def _round_up(x: int, m: int) -> int:
    return (x + m - 1) // m * m


# ---------------------------------------------------------------------------
# Fused kernel: im2col 3x3 conv (single matmul) + bias + ReLU + masked GAP sum
# ---------------------------------------------------------------------------
def _make_fused_kernel(tp: int, pos: int, tiles_per_split: int, need_mask: bool):
    def kernel(x_ref, w_ref, cb_ref, o_ref):
        t = pl.program_id(2)

        @pl.when(t == 0)
        def _init():
            o_ref[...] = jnp.zeros_like(o_ref)

        cout_p = o_ref.shape[-1]

        patch = x_ref[0]                                    # (tp, 9*cin) bf16
        y = jnp.dot(patch, w_ref[...],                      # one MXU matmul, K = 9*cin
                    preferred_element_type=jnp.float32)     # (tp, cout_p) f32
        y = jnp.maximum(y + cb_ref[...], 0.0)               # bias + ReLU

        if need_mask:
            s = pl.program_id(1)
            p0 = (s * tiles_per_split + t) * tp
            idx = p0 + jax.lax.broadcasted_iota(jnp.int32, (tp, 1), 0)
            y = jnp.where(idx < pos, y, 0.0)                 # zero out padded positions

        # Masked global-average-pool partial sum: sublane reduce (VPU/XLU slots).
        part = jnp.sum(y, axis=0, keepdims=True)             # (1, cout_p) f32
        o_ref[...] += part.reshape(1, 1, cout_p)

    return kernel


# ---------------------------------------------------------------------------
# Wrapper: preprocess + im2col packing (XLA glue), one pallas_call, BN-neck tail
# ---------------------------------------------------------------------------
def baseline_forward(x_nchw, params, *, eps=1e-5, max_tile_rows=256, num_splits=None):
    n, cin, h, w = x_nchw.shape
    cout = params["conv_w"].shape[-1]
    cout_p = _round_up(cout, 128)            # lane-dense output channels
    kdim = 9 * cin                           # im2col contraction depth
    pos = h * w
    f32 = jnp.float32

    if num_splits is None:
        # Split the position (reduction) axis across cores only when the batch
        # alone cannot occupy both TensorCores (v7x megacore); harmless elsewhere.
        num_splits = 2 if n == 1 else 1

    tp = max(16, min(max_tile_rows, _round_up(pos, 16)))     # positions per tile
    tiles_per_split = pl.cdiv(pos, tp * num_splits)
    num_tiles = tiles_per_split * num_splits
    pos_padded = num_tiles * tp
    need_mask = pos_padded != pos

    # ---- preprocess: (x - pixel_mean) / pixel_std, NHWC, bf16 ---------------
    mean = params["pixel_mean"].astype(f32).reshape(1, 1, 1, cin)
    inv_std = (1.0 / params["pixel_std"].astype(f32)).reshape(1, 1, 1, cin)
    x_nhwc = jnp.transpose(x_nchw, (0, 2, 3, 1)).astype(f32)
    xn = ((x_nhwc - mean) * inv_std).astype(jnp.bfloat16)
    xp = jnp.pad(xn, ((0, 0), (1, 1), (1, 1), (0, 0)))        # zero pad == "SAME" conv

    # ---- im2col patches: (n, pos_padded, 9*cin), tap-major / cin-minor ------
    taps = [xp[:, kh:kh + h, kw:kw + w, :] for kh in range(3) for kw in range(3)]
    x_patch = jnp.concatenate(taps, axis=-1).reshape(n, pos, kdim)
    if pos_padded != pos:
        x_patch = jnp.pad(x_patch, ((0, 0), (0, pos_padded - pos), (0, 0)))

    # ---- conv weights / bias laid out for the fused matmul ------------------
    w_eff = params["conv_w"].astype(jnp.bfloat16).reshape(kdim, cout)
    w_eff = jnp.pad(w_eff, ((0, 0), (0, cout_p - cout)))
    cb = jnp.pad(params["conv_b"].astype(f32), (0, cout_p - cout)).reshape(1, cout_p)

    kernel = _make_fused_kernel(tp, pos, tiles_per_split, need_mask)

    # ---- VMEM budget (lane / sublane padding accounted for) -----------------
    lane = lambda c: _round_up(c, 128)
    patch_blk = _round_up(tp, 16) * lane(kdim) * 2            # bf16 input block
    w_blk = _round_up(kdim, 16) * lane(cout_p) * 2            # bf16 weights
    cb_blk = 8 * lane(cout_p) * 4                             # f32 bias
    out_blk = 8 * lane(cout_p) * 4                            # f32 output block
    compute_ws = 3 * _round_up(tp, 8) * lane(cout_p) * 4      # y / masked / sum temps
    vmem_limit = int(min(96 * 2**20,
                         max(8 * 2**20,
                             2 * (2 * (patch_blk + w_blk + cb_blk + out_blk) + compute_ws))))

    flops = 2 * n * pos_padded * kdim * cout_p + 3 * n * pos_padded * cout_p
    bytes_accessed = (n * pos_padded * kdim * 2 + kdim * cout_p * 2
                      + cout_p * 4 + n * num_splits * cout_p * 4)

    sums = pl.pallas_call(
        kernel,
        out_shape=jax.ShapeDtypeStruct((n * num_splits, 1, cout_p), f32),
        grid_spec=pltpu.PrefetchScalarGridSpec(
            num_scalar_prefetch=0,
            grid=(n, num_splits, tiles_per_split),
            in_specs=[
                pl.BlockSpec((1, tp, kdim),
                             lambda i, s, t: (i, s * tiles_per_split + t, 0)),  # patches
                pl.BlockSpec((kdim, cout_p), lambda i, s, t: (0, 0)),           # conv weights
                pl.BlockSpec((1, cout_p), lambda i, s, t: (0, 0)),              # conv bias
            ],
            out_specs=pl.BlockSpec((1, 1, cout_p),
                                   lambda i, s, t: (i * num_splits + s, 0, 0)),
        ),
        compiler_params=pltpu.CompilerParams(
            dimension_semantics=("parallel", "parallel", "arbitrary"),
            vmem_limit_bytes=vmem_limit,
        ),
        cost_estimate=pl.CostEstimate(flops=int(flops), transcendentals=0,
                                      bytes_accessed=int(bytes_accessed)),
    )(x_patch, w_eff, cb)

    # ---- GAP divisor + BN-neck (eval) affine on the tiny (N, Cout) result ---
    pooled = sums.reshape(n, num_splits, cout_p).sum(axis=1)[:, :cout] / float(pos)
    scale = params["bn_gamma"].astype(f32) * jax.lax.rsqrt(params["bn_var"].astype(f32) + eps)
    shift = params["bn_beta"].astype(f32) - params["bn_mean"].astype(f32) * scale
    return pooled * scale + shift                              # (N, Cout) embedding


# ---------------------------------------------------------------------------
# Pure-JAX reference (correctness check) and parameter construction
# ---------------------------------------------------------------------------
def reference_forward(x_nchw, params, eps=1e-5):
    mean = params["pixel_mean"].reshape(1, -1, 1, 1)
    std = params["pixel_std"].reshape(1, -1, 1, 1)
    xn = jnp.transpose((x_nchw - mean) / std, (0, 2, 3, 1))          # NHWC
    y = jax.lax.conv_general_dilated(
        xn, params["conv_w"], window_strides=(1, 1), padding="SAME",
        dimension_numbers=("NHWC", "HWIO", "NHWC"))
    y = jnp.maximum(y + params["conv_b"], 0.0)
    pooled = y.mean(axis=(1, 2))
    scale = params["bn_gamma"] / jnp.sqrt(params["bn_var"] + eps)
    return pooled * scale + (params["bn_beta"] - params["bn_mean"] * scale)


def make_params(cin, cout, key):
    k_w, k_b, k_g, k_bt = jax.random.split(key, 4)
    return {
        "pixel_mean": jnp.array([120.0, 115.0, 100.0, 110.0][:cin], jnp.float32),
        "pixel_std": jnp.array([58.0, 57.0, 57.5, 60.0][:cin], jnp.float32),
        "conv_w": 0.05 * jax.random.normal(k_w, (3, 3, cin, cout), jnp.float32),
        "conv_b": 0.01 * jax.random.normal(k_b, (cout,), jnp.float32),
        "bn_gamma": 1.0 + 0.1 * jax.random.normal(k_g, (cout,), jnp.float32),
        "bn_beta": 0.1 * jax.random.normal(k_bt, (cout,), jnp.float32),
        "bn_mean": jnp.zeros((cout,), jnp.float32),
        "bn_var": jnp.ones((cout,), jnp.float32),
    }


if __name__ == "__main__":
    key = jax.random.PRNGKey(0)
    k1, k2, k3, k4 = jax.random.split(key, 4)

    fwd = jax.jit(baseline_forward)

    # Case 1: batch of 2, 4-channel 16x16 images, 32 output channels.
    x1 = 255.0 * jax.random.uniform(k1, (2, 4, 16, 16), jnp.float32)
    p1 = make_params(4, 32, k2)
    out1 = jax.block_until_ready(fwd(x1, p1))
    ref1 = reference_forward(x1, p1)
    assert out1.shape == (2, 32), out1.shape
    assert bool(jnp.all(jnp.isfinite(out1)))
    assert bool(jnp.allclose(out1, ref1, rtol=5e-2, atol=3e-2)), (
        float(jnp.max(jnp.abs(out1 - ref1))))

    # Case 2: single image -> exercises the position-axis core split, the
    # in-kernel validity mask, and Cout > 128 lane padding.
    x2 = 255.0 * jax.random.uniform(k3, (1, 3, 20, 20), jnp.float32)
    p2 = make_params(3, 160, k4)
    out2 = jax.block_until_ready(fwd(x2, p2))
    ref2 = reference_forward(x2, p2)
    assert out2.shape == (1, 160), out2.shape
    assert bool(jnp.all(jnp.isfinite(out2)))
    assert bool(jnp.allclose(out2, ref2, rtol=5e-2, atol=3e-2)), (
        float(jnp.max(jnp.abs(out2 - ref2))))

    print("KERNEL_OK")
</pallas_src>

<mosaic_0001>
module attributes {stable_mosaic.version = 11 : i64} {
  func.func @kernel(%arg0: i32, %arg1: i32, %arg2: i32, %arg3: memref<1x256x36xbf16, #tpu.memory_space<vmem>>, %arg4: memref<36x128xbf16, #tpu.memory_space<vmem>>, %arg5: memref<1x128xf32, #tpu.memory_space<vmem>>, %arg6: memref<1x1x128xf32, #tpu.memory_space<vmem>>) attributes {dimension_semantics = [#tpu.dimension_semantics<parallel>, #tpu.dimension_semantics<parallel>, #tpu.dimension_semantics<arbitrary>], iteration_bounds = array<i64: 2, 1, 1>, scalar_prefetch = 0 : i64, scratch_operands = 0 : i64, tpu.core_type = #tpu.core_type<tc>, window_params = [{transform_indices = @transform_0, window_bounds = array<i64: 1, 256, 36>}, {pipeline_mode = #tpu.pipeline_mode<synchronous>, transform_indices = @transform_1, window_bounds = array<i64: 36, 128>}, {pipeline_mode = #tpu.pipeline_mode<synchronous>, transform_indices = @transform_2, window_bounds = array<i64: 1, 128>}, {transform_indices = @transform_3, window_bounds = array<i64: 1, 1, 128>}]} {
    %c0_i32 = arith.constant 0 : i32
    %0 = arith.cmpi eq, %arg2, %c0_i32 : i32
    %1 = arith.extui %0 : i1 to i32
    %c0_i32_0 = arith.constant 0 : i32
    %2 = arith.cmpi ne, %1, %c0_i32_0 : i32
    scf.if %2 {
      %cst_15 = arith.constant 0.000000e+00 : f32
      %18 = vector.broadcast %cst_15 : f32 to vector<1x1x128xf32>
      %c0_16 = arith.constant 0 : index
      %c0_17 = arith.constant 0 : index
      %c0_18 = arith.constant 0 : index
      %19 = vector.load %arg6[%c0_16, %c0_17, %c0_18] : memref<1x1x128xf32, #tpu.memory_space<vmem>>, vector<1x1x128xf32>
      tpu.vector_store %arg6[%c0_16, %c0_17, %c0_18], %18 {strides = array<i32>} : memref<1x1x128xf32, #tpu.memory_space<vmem>>, vector<1x1x128xf32>,
    } else {
    }
    %c0 = arith.constant 0 : index
    %c0_1 = arith.constant 0 : index
    %c0_2 = arith.constant 0 : index
    %3 = vector.load %arg3[%c0, %c0_1, %c0_2] : memref<1x256x36xbf16, #tpu.memory_space<vmem>>, vector<1x256x36xbf16>
    %4 = vector.shape_cast %3 : vector<1x256x36xbf16> to vector<256x36xbf16>
    %c0_3 = arith.constant 0 : index
    %c0_4 = arith.constant 0 : index
    %5 = vector.load %arg4[%c0_3, %c0_4] : memref<36x128xbf16, #tpu.memory_space<vmem>>, vector<36x128xbf16>
    %cst = arith.constant dense<0.000000e+00> : vector<256x128xf32>
    %6 = tpu.matmul %4, %5, %cst {dimension_numbers = #tpu.dot_dimension_numbers<[1], [0], [0], [1], [0, 0, 1, 1], [], []>} : vector<256x36xbf16>, vector<36x128xbf16>, vector<256x128xf32> -> vector<256x128xf32>
    %c0_5 = arith.constant 0 : index
    %c0_6 = arith.constant 0 : index
    %7 = vector.load %arg5[%c0_5, %c0_6] : memref<1x128xf32, #tpu.memory_space<vmem>>, vector<1x128xf32>
    %8 = vector.broadcast %7 : vector<1x128xf32> to vector<256x128xf32>
    %9 = arith.addf %6, %8 : vector<256x128xf32>
    %cst_7 = arith.constant 0.000000e+00 : f32
    %10 = vector.broadcast %cst_7 : f32 to vector<256x128xf32>
    %11 = arith.maximumf %9, %10 : vector<256x128xf32>
    %cst_8 = arith.constant dense<0.000000e+00> : vector<128xf32>
    %12 = vector.multi_reduction <add>, %11, %cst_8 [0] : vector<256x128xf32> to vector<128xf32>
    %13 = vector.shape_cast %12 : vector<128xf32> to vector<1x128xf32>
    %c0_9 = arith.constant 0 : index
    %c0_10 = arith.constant 0 : index
    %c0_11 = arith.constant 0 : index
    %14 = vector.load %arg6[%c0_9, %c0_10, %c0_11] : memref<1x1x128xf32, #tpu.memory_space<vmem>>, vector<1x1x128xf32>
    %15 = vector.shape_cast %13 : vector<1x128xf32> to vector<1x1x128xf32>
    %16 = arith.addf %14, %15 : vector<1x1x128xf32>
    %c0_12 = arith.constant 0 : index
    %c0_13 = arith.constant 0 : index
    %c0_14 = arith.constant 0 : index
    %17 = vector.load %arg6[%c0_12, %c0_13, %c0_14] : memref<1x1x128xf32, #tpu.memory_space<vmem>>, vector<1x1x128xf32>
    tpu.vector_store %arg6[%c0_12, %c0_13, %c0_14], %16 {strides = array<i32>} : memref<1x1x128xf32, #tpu.memory_space<vmem>>, vector<1x1x128xf32>,
    return
  }
  func.func @transform_0(%arg0: i32, %arg1: i32, %arg2: i32) -> (i32, i32, i32) {
    %c1_i32 = arith.constant 1 : i32
    %0 = arith.muli %arg1, %c1_i32 : i32
    %1 = arith.addi %0, %arg2 : i32
    %c0_i32 = arith.constant 0 : i32
    %c0_i32_0 = arith.constant 0 : i32
    return %arg0, %1, %c0_i32 : i32, i32, i32
  }
  func.func @transform_1(%arg0: i32, %arg1: i32, %arg2: i32) -> (i32, i32) {
    %c0_i32 = arith.constant 0 : i32
    %c0_i32_0 = arith.constant 0 : i32
    %c0_i32_1 = arith.constant 0 : i32
    return %c0_i32, %c0_i32_0 : i32, i32
  }
  func.func @transform_2(%arg0: i32, %arg1: i32, %arg2: i32) -> (i32, i32) {
    %c0_i32 = arith.constant 0 : i32
    %c0_i32_0 = arith.constant 0 : i32
    %c0_i32_1 = arith.constant 0 : i32
    return %c0_i32, %c0_i32_0 : i32, i32
  }
  func.func @transform_3(%arg0: i32, %arg1: i32, %arg2: i32) -> (i32, i32, i32) {
    %c1_i32 = arith.constant 1 : i32
    %0 = arith.muli %arg0, %c1_i32 : i32
    %1 = arith.addi %0, %arg1 : i32
    %c0_i32 = arith.constant 0 : i32
    %c0_i32_0 = arith.constant 0 : i32
    %c0_i32_1 = arith.constant 0 : i32
    return %1, %c0_i32, %c0_i32_0 : i32, i32, i32
  }
}

</mosaic_0001>

<bundles_post_ra>
// kernel: baseline_forward.1
= control target key start
LH: loop header
LB: loop body
LE: loop exit
PB: predicated region body
PF: predicated region fallthrough
CT: control target
= control target key end

     0   :  { %s913_s12 = smov 0   ;;  %s915_s13 = smov 0   ;;  %s1053_s0 = inlined_call_operand.vmem [shape: bf16[2,256,36], index: 0, kind: input, shape index: {}]   ;;  %s1054_s1 = inlined_call_operand.vmem [shape: bf16[36,128], index: 1, kind: input, shape index: {}]   ;;  %s1055_s2 = inlined_call_operand.vmem [shape: f32[1,128], index: 2, kind: input, shape index: {}]   ;;  %s1056_s3 = inlined_call_operand.vmem [shape: f32[2,1,128], index: 3, kind: output, shape index: {}]  }
   0x1   :  { %s917_s14 = smov 0  }
   0x2 LB: > { %s32_s15 = sadd.s32 1, %s886_s13  ;;  %p717_p0 = scmp.ge.s32.totalorder %s890_s14, 1  ;;  %s890_s14 = sphi %s917_s14, %s13_s14   ;;  %s886_s13 = sphi %s915_s13, %s1058_s13   ;;  %s882_s12 = sphi %s913_s12, %s1057_s12  }
   0x3   : > { %p34_p1 = scmp.ge.s32.totalorder %s32_s15, 2  ;;  %p169_p2 = scmp.lt.s32.totalorder %s890_s14, 3 }
   0x5   : > { %s1060_s15 = smov (%p34_p1, %s32_s15), 0  ;;  %p170_p3 = pnand %p717_p0, %p169_p2 }
   0x6   : > { %v849_v0 = vld [vmem:[%s1054_s1] sm:$0xff] (!%p170_p3)   ;;  %v850_v1 = vld [vmem:[%s1054_s1 + $0x8] sm:$0xff] (!%p170_p3)   ;;  %p199_p4 = scmp.lt.s32.totalorder (!%p170_p3), %s882_s12, 1  ;;  %v851_v2 = vld [vmem:[%s1054_s1 + $0x10] ss:$0 sps:$4 sm:$0x33] (!%p170_p3)  }
   0x7   : > { %173 = sbr.rel (%p170_p3) target bundleno = 315 (0x13b), region = 32  ;;  %778 = vmatprep.subr.bf16.mxu0 (!%p170_p3), %v849_v0  ;;  %816 = vmatprep.subr.bf16.mxu1 (!%p170_p3), %v849_v0  ;;  %vm408_vm0 = vcmask (!%p170_p3), 1041408   ;;  %vm359_vm1 = vcmask (!%p170_p3), 293888   ;;  %v892_v20 = vmov (!%p170_p3), 0.0   ;;  %v990_v21 = vld [vmem:[%s1055_s2] ss:$0 sm:$0xff] (!%p170_p3) }
   0x8   : > { %779 = vmatpush3.bf16.msra.mxu0 (!%p170_p3), %v849_v0  ;;  %819 = vmatpush3.bf16.msra.mxu1 (!%p170_p3), %v849_v0  ;;  %v410_v4 = vsel (!%p170_p3), %vm408_vm0, %v851_v2, 0 }
   0x9   : > { %780 = vmatprep.subr.bf16.mxu0 (!%p170_p3), %v850_v1  ;;  %817 = vmatprep.subr.bf16.mxu1 (!%p170_p3), %v850_v1 }
   0xc   : > { %781 = vmatpush3.bf16.msra.mxu0 (!%p170_p3), %v850_v1  ;;  %820 = vmatpush3.bf16.msra.mxu1 (!%p170_p3), %v850_v1 }
   0xd   : > { %822 = vmatprep.subr.msk.bf16.mxu0 (!%p170_p3), %vm408_vm0, %v851_v2  ;;  %823 = vmatprep.subr.msk.bf16.mxu1 (!%p170_p3), %vm408_vm0, %v851_v2 }
   0xe   : > { %s1062_s12 = smov (!%p199_p4, %s882_s12), 1 }
   0xf   : > { %s758_s22 = sshll.u32 %s1062_s12, 7  ;;  %s984_s28 = scalar_lea.vmem %s1056_s3, %s1062_s12 }
  0x10   : > { %s946_s25 = scalar_lea.vmem %s1053_s0, %s758_s22  ;;  %783 = vmatpush3.bf16.msra.mxu0 %v410_v4  ;;  %821 = vmatpush3.bf16.msra.mxu1 %v410_v4  ;;  %219 = vst [vmem:[%s984_s28] sm:$0x1] %v892_v20 }
  0x11   : > { %v852_v3 = vld [vmem:[%s946_s25] sm:$0xff]   ;;  %v853_v5 = vld [vmem:[%s946_s25 + $0x8] sm:$0xff]   ;;  %v854_v6 = vld [vmem:[%s946_s25 + $0x10] sm:$0xff]  }
  0x12   : > { %784 = vmatprep.mubr.msk.bf16.mxu0 %vm359_vm1, %v852_v3  ;;  %v860_v7 = vld [vmem:[%s946_s25 + $0x40] sm:$0xff]   ;;  %v861_v8 = vld [vmem:[%s946_s25 + $0x48] sm:$0xff]   ;;  %v862_v9 = vld [vmem:[%s946_s25 + $0x50] sm:$0xff]  }
  0x13   : > { %785 = vmatmul.mubr.msk.bf16.vlgmr.msra.gmra.mrb[0].mxu0 %vm359_vm1, %v853_v5  ;;  %800 = vmatprep.mubr.msk.bf16.mxu1 %vm359_vm1, %v860_v7  ;;  %v855_v10 = vld [vmem:[%s946_s25 + $0x18] sm:$0xff]   ;;  %v856_v11 = vld [vmem:[%s946_s25 + $0x20] sm:$0xff]   ;;  %v857_v14 = vld [vmem:[%s946_s25 + $0x28] sm:$0xff]  }
  0x14   : > { %788 = vmatprep.mubr.msk.bf16.mxu0 %vm359_vm1, %v854_v6  ;;  %801 = vmatmul.mubr.msk.bf16.vlgmr.msra.gmra.mrb[0].mxu1 %vm359_vm1, %v861_v8  ;;  %v863_v12 = vld [vmem:[%s946_s25 + $0x58] sm:$0xff]   ;;  %v864_v13 = vld [vmem:[%s946_s25 + $0x60] sm:$0xff]   ;;  %v858_v15 = vld [vmem:[%s946_s25 + $0x30] sm:$0xff]  }
  0x15   : > { %804 = vmatprep.mubr.msk.bf16.mxu1 %vm359_vm1, %v862_v9  ;;  %v865_v16 = vld [vmem:[%s946_s25 + $0x68] sm:$0xff]   ;;  %v866_v17 = vld [vmem:[%s946_s25 + $0x70] sm:$0xff]   ;;  %v859_v18 = vld [vmem:[%s946_s25 + $0x38] sm:$0xff]  }
  0x16   : > { %v867_v19 = vld [vmem:[%s946_s25 + $0x78] sm:$0xff]  }
  0x1b   : > { %789 = vmatmul.mubr.msk.bf16.gmra.mrb[4].mxu0 %vm359_vm1, %v855_v10 }
  0x1c   : > { %792 = vmatprep.mubr.msk.bf16.mxu0 %vm359_vm1, %v856_v11  ;;  %805 = vmatmul.mubr.msk.bf16.gmra.mrb[4].mxu1 %vm359_vm1, %v863_v12 }
  0x1d   : > { %808 = vmatprep.mubr.msk.bf16.mxu1 %vm359_vm1, %v864_v13 }
  0x23   : > { %793 = vmatmul.mubr.msk.bf16.gmra.mrb[8].mxu0 %vm359_vm1, %v857_v14 }
  0x24   : > { %796 = vmatprep.mubr.msk.bf16.mxu0 %vm359_vm1, %v858_v15  ;;  %809 = vmatmul.mubr.msk.bf16.gmra.mrb[8].mxu1 %vm359_vm1, %v865_v16 }
  0x25   : > { %812 = vmatprep.mubr.msk.bf16.mxu1 %vm359_vm1, %v866_v17 }
  0x2b   : > { %797 = vmatmul.mubr.msk.bf16.gmra.mrb[12].mxu0 %vm359_vm1, %v859_v18 }
  0x2c   : > { %813 = vmatmul.mubr.msk.bf16.gmra.mrb[12].mxu1 %vm359_vm1, %v867_v19 }
  0xe6   : > { %v786_v22 = vpop.f32.mrb[0].mxu0 }
  0xe7   : > { %v446_v23 = vpop.f32.mrb[1].mxu0  ;;  %v455_v27 = vadd.f32 %v786_v22, %v990_v21  ;;  %v995_v29 = vpop.f32.mrb[0].mxu1 }
  0xe8   : > { %v447_v24 = vadd.f32 %v990_v21, %v446_v23  ;;  %v787_v25 = vpop.f32.mrb[2].mxu0  ;;  %v997_v30 = vpop.f32.mrb[1].mxu1 }
  0xe9   : > { %v449_v26 = vpop.f32.mrb[3].mxu0  ;;  %v458_v32 = vadd.f32 %v787_v25, %v990_v21  ;;  %v1000_v34 = vpop.f32.mrb[2].mxu1  ;;  %v575_v36 = vmax.f32 %v455_v27, 0.0 }
  0xea   : > { %v450_v28 = vadd.f32 %v990_v21, %v449_v26  ;;  %v573_v31 = vmax.f32 %v447_v24, 0.0  ;;  %v1002_v35 = vpop.f32.mrb[3].mxu1 }
  0xeb   : > { %v576_v40 = vmax.f32 %v458_v32, 0.0 }
  0xec   : > { %v574_v33 = vmax.f32 %v450_v28, 0.0 }
  0xee   : > { %v605_v37 = vadd.f32 %v574_v33, %v573_v31  ;;  %v790_v38 = vpop.f32.mrb[4].mxu0  ;;  %v511_v33 = vadd.f32 %v990_v21, %v997_v30 }
  0xef   : > { %v462_v39 = vpop.f32.mrb[5].mxu0  ;;  %v471_v45 = vadd.f32 %v790_v38, %v990_v21  ;;  %v1007_v49 = vpop.f32.mrb[4].mxu1 }
  0xf0   : > { %v606_v41 = vadd.f32 %v605_v37, %v575_v36  ;;  %v463_v42 = vadd.f32 %v990_v21, %v462_v39  ;;  %v791_v43 = vpop.f32.mrb[6].mxu0  ;;  %v526_v50 = vpop.f32.mrb[5].mxu1 }
  0xf1   : > { %v465_v44 = vpop.f32.mrb[7].mxu0  ;;  %v474_v52 = vadd.f32 %v791_v43, %v990_v21  ;;  %v1010_v54 = vpop.f32.mrb[6].mxu1  ;;  %v579_v56 = vmax.f32 %v471_v45, 0.0  ;;  %v514_v43 = vadd.f32 %v990_v21, %v1002_v35  ;;  %v527_v30 = vadd.f32 %v990_v21, %v526_v50 }
  0xf2   : > { %v577_v46 = vmax.f32 %v463_v42, 0.0  ;;  %v607_v47 = vadd.f32 %v606_v41, %v576_v40  ;;  %v466_v48 = vadd.f32 %v990_v21, %v465_v44  ;;  %v529_v55 = vpop.f32.mrb[7].mxu1  ;;  %v589_v42 = vmax.f32 %v511_v33, 0.0 }
  0xf3   : > { %v580_v60 = vmax.f32 %v474_v52, 0.0  ;;  %v519_v44 = vadd.f32 %v995_v29, %v990_v21  ;;  %v535_v35 = vadd.f32 %v1007_v49, %v990_v21 }
  0xf4   : > { %v608_v51 = vadd.f32 %v607_v47, %v577_v46  ;;  %v578_v53 = vmax.f32 %v466_v48, 0.0  ;;  %v522_v47 = vadd.f32 %v1000_v34, %v990_v21  ;;  %v590_v48 = vmax.f32 %v514_v43, 0.0 }
  0xf6   : > { %v609_v57 = vadd.f32 %v608_v51, %v578_v53  ;;  %v794_v58 = vpop.f32.mrb[8].mxu0  ;;  %v591_v51 = vmax.f32 %v519_v44, 0.0  ;;  %v592_v53 = vmax.f32 %v522_v47, 0.0 }
  0xf7   : > { %v478_v59 = vpop.f32.mrb[9].mxu0  ;;  %v487_v1 = vadd.f32 %v794_v58, %v990_v21  ;;  %v810_v5 = vpop.f32.mrb[8].mxu1  ;;  %v530_v58 = vadd.f32 %v990_v21, %v529_v55 }
  0xf8   : > { %v610_v61 = vadd.f32 %v609_v57, %v579_v56  ;;  %v479_v62 = vadd.f32 %v990_v21, %v478_v59  ;;  %v795_v63 = vpop.f32.mrb[10].mxu0  ;;  %v542_v6 = vpop.f32.mrb[9].mxu1  ;;  %v593_v57 = vmax.f32 %v527_v30, 0.0  ;;  %v551_v55 = vadd.f32 %v810_v5, %v990_v21 }
  0xf9   : > { %v481_v0 = vpop.f32.mrb[11].mxu0  ;;  %v490_v8 = vadd.f32 %v795_v63, %v990_v21  ;;  %v811_v10 = vpop.f32.mrb[10].mxu1  ;;  %v583_v12 = vmax.f32 %v487_v1, 0.0  ;;  %v543_v34 = vadd.f32 %v990_v21, %v542_v6 }
  0xfa   : > { %v581_v2 = vmax.f32 %v479_v62, 0.0  ;;  %v611_v3 = vadd.f32 %v610_v61, %v580_v60  ;;  %v482_v4 = vadd.f32 %v990_v21, %v481_v0  ;;  %v545_v11 = vpop.f32.mrb[11].mxu1  ;;  %v538_v60 = vadd.f32 %v1010_v54, %v990_v21 }
  0xfb   : > { %v584_v16 = vmax.f32 %v490_v8, 0.0  ;;  %v594_v61 = vmax.f32 %v530_v58, 0.0  ;;  %v595_v62 = vmax.f32 %v535_v35, 0.0  ;;  %v597_v1 = vmax.f32 %v543_v34, 0.0 }
  0xfc   : > { %v612_v7 = vadd.f32 %v611_v3, %v581_v2  ;;  %v582_v9 = vmax.f32 %v482_v4, 0.0  ;;  %v596_v63 = vmax.f32 %v538_v60, 0.0  ;;  %v546_v2 = vadd.f32 %v990_v21, %v545_v11 }
  0xfd   : > { %v554_v49 = vadd.f32 %v811_v10, %v990_v21  ;;  %v599_v54 = vmax.f32 %v551_v55, 0.0 }
  0xfe   : > { %v613_v13 = vadd.f32 %v612_v7, %v582_v9  ;;  %v798_v14 = vpop.f32.mrb[12].mxu0  ;;  %v598_v7 = vmax.f32 %v546_v2, 0.0 }
  0xff   : > { %v494_v15 = vpop.f32.mrb[13].mxu0  ;;  %v503_v22 = vadd.f32 %v798_v14, %v990_v21  ;;  %v814_v26 = vpop.f32.mrb[12].mxu1 }
 0x100   : > { %v614_v17 = vadd.f32 %v613_v13, %v583_v12  ;;  %v495_v18 = vadd.f32 %v990_v21, %v494_v15  ;;  %v799_v19 = vpop.f32.mrb[14].mxu0  ;;  %v558_v27 = vpop.f32.mrb[13].mxu1  ;;  %v600_v12 = vmax.f32 %v554_v49, 0.0  ;;  %v567_v15 = vadd.f32 %v814_v26, %v990_v21 }
 0x101   : > { %v497_v20 = vpop.f32.mrb[15].mxu0  ;;  %v506_v31 = vadd.f32 %v799_v19, %v990_v21  ;;  %v815_v36 = vpop.f32.mrb[14].mxu1  ;;  %v587_v38 = vmax.f32 %v503_v22, 0.0  ;;  %v559_v8 = vadd.f32 %v990_v21, %v558_v27 }
 0x102   : > { %v585_v23 = vmax.f32 %v495_v18, 0.0  ;;  %v615_v24 = vadd.f32 %v614_v17, %v584_v16  ;;  %v498_v25 = vadd.f32 %v990_v21, %v497_v20  ;;  %v561_v37 = vpop.f32.mrb[15].mxu1  ;;  %v570_v5 = vadd.f32 %v815_v36, %v990_v21 }
 0x103   : > { %v588_v40 = vmax.f32 %v506_v31, 0.0  ;;  %v601_v13 = vmax.f32 %v559_v8, 0.0  ;;  %v562_v14 = vadd.f32 %v990_v21, %v561_v37  ;;  %v603_v10 = vmax.f32 %v567_v15, 0.0  ;;  %v642_v31 = vld [vmem:[%s984_s28] sm:$0x1] }
 0x104   : > { %v616_v28 = vadd.f32 %v615_v24, %v585_v23  ;;  %v586_v32 = vmax.f32 %v498_v25, 0.0  ;;  %v604_v19 = vmax.f32 %v570_v5, 0.0 }
 0x105   : > { %v602_v17 = vmax.f32 %v562_v14, 0.0 }
 0x106   : > { %v617_v39 = vadd.f32 %v616_v28, %v586_v32 }
 0x108   : > { %v618_v41 = vadd.f32 %v617_v39, %v587_v38 }
 0x10a   : > { %v619_v45 = vadd.f32 %v618_v41, %v588_v40 }
 0x10c   : > { %v620_v46 = vadd.f32 %v619_v45, %v589_v42 }
 0x10e   : > { %v621_v52 = vadd.f32 %v620_v46, %v590_v48 }
 0x110   : > { %v622_v56 = vadd.f32 %v621_v52, %v591_v51 }
 0x112   : > { %v623_v59 = vadd.f32 %v622_v56, %v592_v53 }
 0x114   : > { %v624_v29 = vadd.f32 %v623_v59, %v593_v57 }
 0x116   : > { %v625_v50 = vadd.f32 %v624_v29, %v594_v61 }
 0x118   : > { %v626_v0 = vadd.f32 %v625_v50, %v595_v62 }
 0x11a   : > { %v627_v3 = vadd.f32 %v626_v0, %v596_v63 }
 0x11c   : > { %v628_v4 = vadd.f32 %v627_v3, %v597_v1 }
 0x11e   : > { %v629_v9 = vadd.f32 %v628_v4, %v598_v7 }
 0x120   : > { %v630_v6 = vadd.f32 %v629_v9, %v599_v54 }
 0x122   : > { %v631_v11 = vadd.f32 %v630_v6, %v600_v12 }
 0x124   : > { %v632_v16 = vadd.f32 %v631_v11, %v601_v13 }
 0x126   : > { %v633_v18 = vadd.f32 %v632_v16, %v602_v17 }
 0x128   : > { %v634_v20 = vadd.f32 %v633_v18, %v603_v10 }
 0x12a   : > { %v635_v22 = vadd.f32 %v634_v20, %v604_v19 }
 0x12c   : > { %v636_v23 = vrot.slane %v635_v22, 4 }
 0x12e   : > { %v637_v24 = vadd.f32 %v636_v23, %v635_v22 }
 0x130   : > { %v638_v25 = vrot.slane %v637_v24, 2 }
 0x132   : > { %v639_v27 = vadd.f32 %v638_v25, %v637_v24 }
 0x134   : > { %v640_v28 = vrot.slane %v639_v27, 1 }
 0x136   : > { %v641_v32 = vadd.f32 %v640_v28, %v639_v27 }
 0x138   : > { %v643_v33 = vadd.f32 %v642_v31, %v641_v32 }
 0x13a   : > { %644 = vst [vmem:[%s984_s28] sm:$0x1] %v643_v33 }
 0x13b PF: > { %s13_s14 = sadd.s32 1, %s890_s14   ;;  %s1057_s12 = smov %s886_s13 }
 0x13c   : > { %p10_p5 = scmp.ge.s32.totalorder %s13_s14, 4   ;;  %s1058_s13 = smov %s1060_s15 }
 0x13e   :  { %12 = sbr.rel (!%p10_p5) target bundleno = 2 (0x2), region = 66 }

</bundles_post_ra>
